<compile_context>
chip_gen: v6e
topology: v6e:2x2x1
jax: 0.10.0
libtpu: 0.0.40
codegen_flags: <defaults>
</compile_context>

<pallas_src>
import numpy as np
import jax
import jax.numpy as jnp
from jax.experimental import pallas as pl
from jax.experimental.pallas import tpu as pltpu


# ----------------------------------------------------------------------------
# Pallas kernel: one batch element per grid step, lane-dense (C, H*W) layout
# ----------------------------------------------------------------------------
def _ca_kernel(x_ref, mh_ref, mw_ref, rh_ref, rw_ref,
               w1_ref, b1_ref, wh_ref, bh_ref, ww_ref, bw_ref,
               out_ref):
    x = x_ref[0]                                                       # (C, H*W)

    # Directional average pools as matmuls (x stays in its lane-dense layout).
    xh = jnp.dot(x, mh_ref[...], preferred_element_type=jnp.float32)   # (C, H)
    xw = jnp.dot(x, mw_ref[...], preferred_element_type=jnp.float32)   # (C, W)

    # conv1 (1x1) with BatchNorm (eval) folded in, + ReLU, per branch.
    yh = jnp.maximum(
        jnp.dot(w1_ref[...], xh, preferred_element_type=jnp.float32) + b1_ref[...], 0.0)  # (mip, H)
    yw = jnp.maximum(
        jnp.dot(w1_ref[...], xw, preferred_element_type=jnp.float32) + b1_ref[...], 0.0)  # (mip, W)

    # conv_h / conv_w (1x1) + sigmoid -> attention factors.
    ah = jax.nn.sigmoid(
        jnp.dot(wh_ref[...], yh, preferred_element_type=jnp.float32) + bh_ref[...])       # (oup, H)
    aw = jax.nn.sigmoid(
        jnp.dot(ww_ref[...], yw, preferred_element_type=jnp.float32) + bw_ref[...])       # (oup, W)

    # Broadcast the factors back to the lane-dense (C, H*W) layout via matmuls.
    ahf = jnp.dot(ah, rh_ref[...], preferred_element_type=jnp.float32)  # (C, H*W)
    awf = jnp.dot(aw, rw_ref[...], preferred_element_type=jnp.float32)  # (C, H*W)

    out_ref[0] = x * ahf * awf


# ----------------------------------------------------------------------------
# Wrapper: NCHW in/out, parameter preprocessing, pallas_call
# ----------------------------------------------------------------------------
def ca_forward_pallas(x, params, eps=1e-5):
    B, C, H, W = x.shape
    HW = H * W

    w1 = params['w1'][:, :, 0, 0].astype(jnp.float32)   # (mip, C)
    wh = params['wh'][:, :, 0, 0].astype(jnp.float32)   # (oup, mip)
    ww = params['ww'][:, :, 0, 0].astype(jnp.float32)   # (oup, mip)
    mip = w1.shape[0]
    oup = wh.shape[0]
    assert oup == C, "CA: out = identity * a_w * a_h requires oup == inp"

    # Fold BatchNorm (eval mode) + conv1 bias into conv1 weight/bias.
    scale = (params['bn_gamma'] / jnp.sqrt(params['bn_var'] + eps)).astype(jnp.float32)
    w1_eff = w1 * scale[:, None]
    b1_eff = (scale * (params['b1'].astype(jnp.float32) - params['bn_mean'])
              + params['bn_beta']).astype(jnp.float32).reshape(mip, 1)
    bhc = params['bh'].astype(jnp.float32).reshape(oup, 1)
    bwc = params['bw'].astype(jnp.float32).reshape(oup, 1)

    # Constant one-hot pooling / broadcast matrices (row-major flattening h*W+w).
    h_idx = jnp.repeat(jnp.arange(H), W)                     # (HW,)
    w_idx = jnp.tile(jnp.arange(W), H)                       # (HW,)
    Rh = jax.nn.one_hot(h_idx, H, dtype=jnp.float32).T       # (H, HW): broadcast over w
    Rw = jax.nn.one_hot(w_idx, W, dtype=jnp.float32).T       # (W, HW): broadcast over h
    Mh = Rh.T / float(W)                                     # (HW, H): mean over w per h
    Mw = Rw.T / float(H)                                     # (HW, W): mean over h per w

    x2d = x.reshape(B, C, HW).astype(jnp.float32)

    batch3 = lambda b: (b, 0, 0)
    full2 = lambda b: (0, 0)

    out2d = pl.pallas_call(
        _ca_kernel,
        out_shape=jax.ShapeDtypeStruct((B, C, HW), jnp.float32),
        grid=(B,),
        in_specs=[
            pl.BlockSpec((1, C, HW), batch3),   # x
            pl.BlockSpec((HW, H), full2),       # Mh
            pl.BlockSpec((HW, W), full2),       # Mw
            pl.BlockSpec((H, HW), full2),       # Rh
            pl.BlockSpec((W, HW), full2),       # Rw
            pl.BlockSpec((mip, C), full2),      # conv1 weight (BN folded)
            pl.BlockSpec((mip, 1), full2),      # conv1 bias   (BN folded)
            pl.BlockSpec((oup, mip), full2),    # conv_h weight
            pl.BlockSpec((oup, 1), full2),      # conv_h bias
            pl.BlockSpec((oup, mip), full2),    # conv_w weight
            pl.BlockSpec((oup, 1), full2),      # conv_w bias
        ],
        out_specs=pl.BlockSpec((1, C, HW), batch3),
        compiler_params=pltpu.CompilerParams(dimension_semantics=("parallel",)),
    )(x2d, Mh, Mw, Rh, Rw, w1_eff, b1_eff, wh, bhc, ww, bwc)

    return out2d.reshape(B, C, H, W)


# ----------------------------------------------------------------------------
# Pure-JAX reference (literal translation of the PyTorch forward) for validation
# ----------------------------------------------------------------------------
def ca_forward_reference(x, params, eps=1e-5):
    B, C, H, W = x.shape
    x_h = jnp.mean(x, axis=3, keepdims=True)                               # pool_h -> (B,C,H,1)
    x_w = jnp.transpose(jnp.mean(x, axis=2, keepdims=True), (0, 1, 3, 2))  # pool_w -> (B,C,W,1)
    y = jnp.concatenate([x_h, x_w], axis=2)                                # (B,C,H+W,1)

    w1 = params['w1'][:, :, 0, 0]
    y = jnp.einsum('oc,bcpq->bopq', w1, y) + params['b1'].reshape(1, -1, 1, 1)
    scale = params['bn_gamma'] / jnp.sqrt(params['bn_var'] + eps)
    y = (y - params['bn_mean'].reshape(1, -1, 1, 1)) * scale.reshape(1, -1, 1, 1) \
        + params['bn_beta'].reshape(1, -1, 1, 1)
    y = jnp.maximum(y, 0.0)

    yh = y[:, :, :H]                                                       # (B,mip,H,1)
    yw = jnp.transpose(y[:, :, H:], (0, 1, 3, 2))                          # (B,mip,1,W)
    wh = params['wh'][:, :, 0, 0]
    ww = params['ww'][:, :, 0, 0]
    a_h = jax.nn.sigmoid(jnp.einsum('om,bmpq->bopq', wh, yh) + params['bh'].reshape(1, -1, 1, 1))
    a_w = jax.nn.sigmoid(jnp.einsum('om,bmpq->bopq', ww, yw) + params['bw'].reshape(1, -1, 1, 1))
    return x * a_w * a_h


# ----------------------------------------------------------------------------
if __name__ == "__main__":
    B, C, H, W = 2, 32, 16, 16        # inp = oup = 32, spatial 16x16
    reduction = 32
    mip = max(8, C // reduction)      # = 8
    oup = C

    key = jax.random.PRNGKey(0)
    ks = jax.random.split(key, 11)
    x = jax.random.normal(ks[0], (B, C, H, W), jnp.float32)

    params = {
        # conv1: Conv2d(inp, mip, 1) with bias, OIHW
        'w1': 0.1 * jax.random.normal(ks[1], (mip, C, 1, 1), jnp.float32),
        'b1': 0.1 * jax.random.normal(ks[2], (mip,), jnp.float32),
        # bn1: BatchNorm2d(mip), eval-mode running stats
        'bn_gamma': 1.0 + 0.1 * jax.random.normal(ks[3], (mip,), jnp.float32),
        'bn_beta': 0.1 * jax.random.normal(ks[4], (mip,), jnp.float32),
        'bn_mean': 0.1 * jax.random.normal(ks[5], (mip,), jnp.float32),
        'bn_var': jax.random.uniform(ks[6], (mip,), jnp.float32, 0.5, 1.5),
        # conv_h / conv_w: Conv2d(mip, oup, 1) with bias
        'wh': 0.1 * jax.random.normal(ks[7], (oup, mip, 1, 1), jnp.float32),
        'bh': 0.1 * jax.random.normal(ks[8], (oup,), jnp.float32),
        'ww': 0.1 * jax.random.normal(ks[9], (oup, mip, 1, 1), jnp.float32),
        'bw': 0.1 * jax.random.normal(ks[10], (oup,), jnp.float32),
    }

    out = jax.block_until_ready(ca_forward_pallas(x, params))
    ref = jax.block_until_ready(ca_forward_reference(x, params))

    assert out.shape == (B, C, H, W)
    np.testing.assert_allclose(np.asarray(out), np.asarray(ref), rtol=1e-4, atol=1e-4)
    print("KERNEL_OK")
</pallas_src>

<mosaic_0001>
module attributes {stable_mosaic.version = 11 : i64} {
  func.func @_ca_kernel(%arg0: i32, %arg1: memref<1x32x256xf32, #tpu.memory_space<vmem>>, %arg2: memref<256x16xf32, #tpu.memory_space<vmem>>, %arg3: memref<256x16xf32, #tpu.memory_space<vmem>>, %arg4: memref<16x256xf32, #tpu.memory_space<vmem>>, %arg5: memref<16x256xf32, #tpu.memory_space<vmem>>, %arg6: memref<8x32xf32, #tpu.memory_space<vmem>>, %arg7: memref<8x1xf32, #tpu.memory_space<vmem>>, %arg8: memref<32x8xf32, #tpu.memory_space<vmem>>, %arg9: memref<32x1xf32, #tpu.memory_space<vmem>>, %arg10: memref<32x8xf32, #tpu.memory_space<vmem>>, %arg11: memref<32x1xf32, #tpu.memory_space<vmem>>, %arg12: memref<1x32x256xf32, #tpu.memory_space<vmem>>) attributes {dimension_semantics = [#tpu.dimension_semantics<parallel>], iteration_bounds = array<i64: 2>, scalar_prefetch = 0 : i64, scratch_operands = 0 : i64, tpu.core_type = #tpu.core_type<tc>, window_params = [{transform_indices = @transform_0, window_bounds = array<i64: 1, 32, 256>}, {pipeline_mode = #tpu.pipeline_mode<synchronous>, transform_indices = @transform_1, window_bounds = array<i64: 256, 16>}, {pipeline_mode = #tpu.pipeline_mode<synchronous>, transform_indices = @transform_2, window_bounds = array<i64: 256, 16>}, {pipeline_mode = #tpu.pipeline_mode<synchronous>, transform_indices = @transform_3, window_bounds = array<i64: 16, 256>}, {pipeline_mode = #tpu.pipeline_mode<synchronous>, transform_indices = @transform_4, window_bounds = array<i64: 16, 256>}, {pipeline_mode = #tpu.pipeline_mode<synchronous>, transform_indices = @transform_5, window_bounds = array<i64: 8, 32>}, {pipeline_mode = #tpu.pipeline_mode<synchronous>, transform_indices = @transform_6, window_bounds = array<i64: 8, 1>}, {pipeline_mode = #tpu.pipeline_mode<synchronous>, transform_indices = @transform_7, window_bounds = array<i64: 32, 8>}, {pipeline_mode = #tpu.pipeline_mode<synchronous>, transform_indices = @transform_8, window_bounds = array<i64: 32, 1>}, {pipeline_mode = #tpu.pipeline_mode<synchronous>, transform_indices = @transform_9, window_bounds = array<i64: 32, 8>}, {pipeline_mode = #tpu.pipeline_mode<synchronous>, transform_indices = @transform_10, window_bounds = array<i64: 32, 1>}, {transform_indices = @transform_11, window_bounds = array<i64: 1, 32, 256>}]} {
    %c0 = arith.constant 0 : index
    %c0_0 = arith.constant 0 : index
    %c0_1 = arith.constant 0 : index
    %0 = vector.load %arg1[%c0, %c0_0, %c0_1] : memref<1x32x256xf32, #tpu.memory_space<vmem>>, vector<1x32x256xf32>
    %1 = vector.shape_cast %0 : vector<1x32x256xf32> to vector<32x256xf32>
    %c0_2 = arith.constant 0 : index
    %c0_3 = arith.constant 0 : index
    %2 = vector.load %arg2[%c0_2, %c0_3] : memref<256x16xf32, #tpu.memory_space<vmem>>, vector<256x16xf32>
    %cst = arith.constant dense<0.000000e+00> : vector<32x16xf32>
    %3 = tpu.matmul %1, %2, %cst {dimension_numbers = #tpu.dot_dimension_numbers<[1], [0], [0], [1], [0, 0, 1, 1], [], []>} : vector<32x256xf32>, vector<256x16xf32>, vector<32x16xf32> -> vector<32x16xf32>
    %c0_4 = arith.constant 0 : index
    %c0_5 = arith.constant 0 : index
    %4 = vector.load %arg3[%c0_4, %c0_5] : memref<256x16xf32, #tpu.memory_space<vmem>>, vector<256x16xf32>
    %cst_6 = arith.constant dense<0.000000e+00> : vector<32x16xf32>
    %5 = tpu.matmul %1, %4, %cst_6 {dimension_numbers = #tpu.dot_dimension_numbers<[1], [0], [0], [1], [0, 0, 1, 1], [], []>} : vector<32x256xf32>, vector<256x16xf32>, vector<32x16xf32> -> vector<32x16xf32>
    %c0_7 = arith.constant 0 : index
    %c0_8 = arith.constant 0 : index
    %6 = vector.load %arg6[%c0_7, %c0_8] : memref<8x32xf32, #tpu.memory_space<vmem>>, vector<8x32xf32>
    %cst_9 = arith.constant dense<0.000000e+00> : vector<8x16xf32>
    %7 = tpu.matmul %6, %3, %cst_9 {dimension_numbers = #tpu.dot_dimension_numbers<[1], [0], [0], [1], [0, 0, 1, 1], [], []>} : vector<8x32xf32>, vector<32x16xf32>, vector<8x16xf32> -> vector<8x16xf32>
    %c0_10 = arith.constant 0 : index
    %c0_11 = arith.constant 0 : index
    %8 = vector.load %arg7[%c0_10, %c0_11] : memref<8x1xf32, #tpu.memory_space<vmem>>, vector<8x1xf32>
    %9 = vector.broadcast %8 : vector<8x1xf32> to vector<8x16xf32>
    %10 = arith.addf %7, %9 : vector<8x16xf32>
    %cst_12 = arith.constant 0.000000e+00 : f32
    %11 = vector.broadcast %cst_12 : f32 to vector<8x16xf32>
    %12 = arith.maximumf %10, %11 : vector<8x16xf32>
    %c0_13 = arith.constant 0 : index
    %c0_14 = arith.constant 0 : index
    %13 = vector.load %arg6[%c0_13, %c0_14] : memref<8x32xf32, #tpu.memory_space<vmem>>, vector<8x32xf32>
    %cst_15 = arith.constant dense<0.000000e+00> : vector<8x16xf32>
    %14 = tpu.matmul %13, %5, %cst_15 {dimension_numbers = #tpu.dot_dimension_numbers<[1], [0], [0], [1], [0, 0, 1, 1], [], []>} : vector<8x32xf32>, vector<32x16xf32>, vector<8x16xf32> -> vector<8x16xf32>
    %c0_16 = arith.constant 0 : index
    %c0_17 = arith.constant 0 : index
    %15 = vector.load %arg7[%c0_16, %c0_17] : memref<8x1xf32, #tpu.memory_space<vmem>>, vector<8x1xf32>
    %16 = vector.broadcast %15 : vector<8x1xf32> to vector<8x16xf32>
    %17 = arith.addf %14, %16 : vector<8x16xf32>
    %cst_18 = arith.constant 0.000000e+00 : f32
    %18 = vector.broadcast %cst_18 : f32 to vector<8x16xf32>
    %19 = arith.maximumf %17, %18 : vector<8x16xf32>
    %c0_19 = arith.constant 0 : index
    %c0_20 = arith.constant 0 : index
    %20 = vector.load %arg8[%c0_19, %c0_20] : memref<32x8xf32, #tpu.memory_space<vmem>>, vector<32x8xf32>
    %cst_21 = arith.constant dense<0.000000e+00> : vector<32x16xf32>
    %21 = tpu.matmul %20, %12, %cst_21 {dimension_numbers = #tpu.dot_dimension_numbers<[1], [0], [0], [1], [0, 0, 1, 1], [], []>} : vector<32x8xf32>, vector<8x16xf32>, vector<32x16xf32> -> vector<32x16xf32>
    %c0_22 = arith.constant 0 : index
    %c0_23 = arith.constant 0 : index
    %22 = vector.load %arg9[%c0_22, %c0_23] : memref<32x1xf32, #tpu.memory_space<vmem>>, vector<32x1xf32>
    %23 = vector.broadcast %22 : vector<32x1xf32> to vector<32x16xf32>
    %24 = arith.addf %21, %23 : vector<32x16xf32>
    %25 = arith.negf %24 : vector<32x16xf32>
    %26 = math.exp %25 : vector<32x16xf32>
    %cst_24 = arith.constant 1.000000e+00 : f32
    %27 = vector.broadcast %cst_24 : f32 to vector<32x16xf32>
    %28 = arith.addf %27, %26 : vector<32x16xf32>
    %29 = arith.divf %27, %28 : vector<32x16xf32>
    %c0_25 = arith.constant 0 : index
    %c0_26 = arith.constant 0 : index
    %30 = vector.load %arg10[%c0_25, %c0_26] : memref<32x8xf32, #tpu.memory_space<vmem>>, vector<32x8xf32>
    %cst_27 = arith.constant dense<0.000000e+00> : vector<32x16xf32>
    %31 = tpu.matmul %30, %19, %cst_27 {dimension_numbers = #tpu.dot_dimension_numbers<[1], [0], [0], [1], [0, 0, 1, 1], [], []>} : vector<32x8xf32>, vector<8x16xf32>, vector<32x16xf32> -> vector<32x16xf32>
    %c0_28 = arith.constant 0 : index
    %c0_29 = arith.constant 0 : index
    %32 = vector.load %arg11[%c0_28, %c0_29] : memref<32x1xf32, #tpu.memory_space<vmem>>, vector<32x1xf32>
    %33 = vector.broadcast %32 : vector<32x1xf32> to vector<32x16xf32>
    %34 = arith.addf %31, %33 : vector<32x16xf32>
    %35 = arith.negf %34 : vector<32x16xf32>
    %36 = math.exp %35 : vector<32x16xf32>
    %cst_30 = arith.constant 1.000000e+00 : f32
    %37 = vector.broadcast %cst_30 : f32 to vector<32x16xf32>
    %38 = arith.addf %37, %36 : vector<32x16xf32>
    %39 = arith.divf %37, %38 : vector<32x16xf32>
    %c0_31 = arith.constant 0 : index
    %c0_32 = arith.constant 0 : index
    %40 = vector.load %arg4[%c0_31, %c0_32] : memref<16x256xf32, #tpu.memory_space<vmem>>, vector<16x256xf32>
    %cst_33 = arith.constant dense<0.000000e+00> : vector<32x256xf32>
    %41 = tpu.matmul %29, %40, %cst_33 {dimension_numbers = #tpu.dot_dimension_numbers<[1], [0], [0], [1], [0, 0, 1, 1], [], []>} : vector<32x16xf32>, vector<16x256xf32>, vector<32x256xf32> -> vector<32x256xf32>
    %c0_34 = arith.constant 0 : index
    %c0_35 = arith.constant 0 : index
    %42 = vector.load %arg5[%c0_34, %c0_35] : memref<16x256xf32, #tpu.memory_space<vmem>>, vector<16x256xf32>
    %cst_36 = arith.constant dense<0.000000e+00> : vector<32x256xf32>
    %43 = tpu.matmul %39, %42, %cst_36 {dimension_numbers = #tpu.dot_dimension_numbers<[1], [0], [0], [1], [0, 0, 1, 1], [], []>} : vector<32x16xf32>, vector<16x256xf32>, vector<32x256xf32> -> vector<32x256xf32>
    %44 = arith.mulf %1, %41 : vector<32x256xf32>
    %45 = arith.mulf %44, %43 : vector<32x256xf32>
    %c0_37 = arith.constant 0 : index
    %c0_38 = arith.constant 0 : index
    %c0_39 = arith.constant 0 : index
    %46 = vector.load %arg12[%c0_37, %c0_38, %c0_39] : memref<1x32x256xf32, #tpu.memory_space<vmem>>, vector<1x32x256xf32>
    %47 = vector.shape_cast %46 : vector<1x32x256xf32> to vector<32x256xf32>
    %48 = vector.shape_cast %45 : vector<32x256xf32> to vector<1x32x256xf32>
    tpu.vector_store %arg12[%c0_37, %c0_38, %c0_39], %48 {strides = array<i32>} : memref<1x32x256xf32, #tpu.memory_space<vmem>>, vector<1x32x256xf32>,
    return
  }
  func.func @transform_0(%arg0: i32) -> (i32, i32, i32) {
    %c0_i32 = arith.constant 0 : i32
    %c0_i32_0 = arith.constant 0 : i32
    %c0_i32_1 = arith.constant 0 : i32
    return %arg0, %c0_i32, %c0_i32_0 : i32, i32, i32
  }
  func.func @transform_1(%arg0: i32) -> (i32, i32) {
    %c0_i32 = arith.constant 0 : i32
    %c0_i32_0 = arith.constant 0 : i32
    %c0_i32_1 = arith.constant 0 : i32
    return %c0_i32, %c0_i32_0 : i32, i32
  }
  func.func @transform_2(%arg0: i32) -> (i32, i32) {
    %c0_i32 = arith.constant 0 : i32
    %c0_i32_0 = arith.constant 0 : i32
    %c0_i32_1 = arith.constant 0 : i32
    return %c0_i32, %c0_i32_0 : i32, i32
  }
  func.func @transform_3(%arg0: i32) -> (i32, i32) {
    %c0_i32 = arith.constant 0 : i32
    %c0_i32_0 = arith.constant 0 : i32
    %c0_i32_1 = arith.constant 0 : i32
    return %c0_i32, %c0_i32_0 : i32, i32
  }
  func.func @transform_4(%arg0: i32) -> (i32, i32) {
    %c0_i32 = arith.constant 0 : i32
    %c0_i32_0 = arith.constant 0 : i32
    %c0_i32_1 = arith.constant 0 : i32
    return %c0_i32, %c0_i32_0 : i32, i32
  }
  func.func @transform_5(%arg0: i32) -> (i32, i32) {
    %c0_i32 = arith.constant 0 : i32
    %c0_i32_0 = arith.constant 0 : i32
    %c0_i32_1 = arith.constant 0 : i32
    return %c0_i32, %c0_i32_0 : i32, i32
  }
  func.func @transform_6(%arg0: i32) -> (i32, i32) {
    %c0_i32 = arith.constant 0 : i32
    %c0_i32_0 = arith.constant 0 : i32
    %c0_i32_1 = arith.constant 0 : i32
    return %c0_i32, %c0_i32_0 : i32, i32
  }
  func.func @transform_7(%arg0: i32) -> (i32, i32) {
    %c0_i32 = arith.constant 0 : i32
    %c0_i32_0 = arith.constant 0 : i32
    %c0_i32_1 = arith.constant 0 : i32
    return %c0_i32, %c0_i32_0 : i32, i32
  }
  func.func @transform_8(%arg0: i32) -> (i32, i32) {
    %c0_i32 = arith.constant 0 : i32
    %c0_i32_0 = arith.constant 0 : i32
    %c0_i32_1 = arith.constant 0 : i32
    return %c0_i32, %c0_i32_0 : i32, i32
  }
  func.func @transform_9(%arg0: i32) -> (i32, i32) {
    %c0_i32 = arith.constant 0 : i32
    %c0_i32_0 = arith.constant 0 : i32
    %c0_i32_1 = arith.constant 0 : i32
    return %c0_i32, %c0_i32_0 : i32, i32
  }
  func.func @transform_10(%arg0: i32) -> (i32, i32) {
    %c0_i32 = arith.constant 0 : i32
    %c0_i32_0 = arith.constant 0 : i32
    %c0_i32_1 = arith.constant 0 : i32
    return %c0_i32, %c0_i32_0 : i32, i32
  }
  func.func @transform_11(%arg0: i32) -> (i32, i32, i32) {
    %c0_i32 = arith.constant 0 : i32
    %c0_i32_0 = arith.constant 0 : i32
    %c0_i32_1 = arith.constant 0 : i32
    return %arg0, %c0_i32, %c0_i32_0 : i32, i32, i32
  }
}

</mosaic_0001>

<bundles_post_ra>
// kernel: tpu_custom_call.1
= control target key start
LH: loop header
LB: loop body
LE: loop exit
PB: predicated region body
PF: predicated region fallthrough
CT: control target
= control target key end

     0   :  { %16 = vsyncpa [#allocation3], 0  ;;  %s2258_s0 = inlined_call_operand.vmem [shape: f32[2,32,256], index: 0, kind: input, shape index: {}]   ;;  %s2259_s1 = inlined_call_operand.vmem [shape: f32[256,16], index: 1, kind: input, shape index: {}]   ;;  %s2260_s2 = inlined_call_operand.vmem [shape: f32[256,16], index: 2, kind: input, shape index: {}]   ;;  %s2261_s3 = inlined_call_operand.vmem [shape: f32[16,256], index: 3, kind: input, shape index: {}]   ;;  %s2262_s4 = inlined_call_operand.vmem [shape: f32[16,256], index: 4, kind: input, shape index: {}]   ;;  %s2263_s5 = inlined_call_operand.vmem [shape: f32[8,32], index: 5, kind: input, shape index: {}]   ;;  %s2264_s6 = inlined_call_operand.vmem [shape: f32[8,1], index: 6, kind: input, shape index: {}]   ;;  %s2265_s7 = inlined_call_operand.vmem [shape: f32[32,8], index: 7, kind: input, shape index: {}]   ;;  %s2266_s8 = inlined_call_operand.vmem [shape: f32[32,1], index: 8, kind: input, shape index: {}]   ;;  %s2267_s9 = inlined_call_operand.vmem [shape: f32[32,8], index: 9, kind: input, shape index: {}]   ;;  %s2268_s10 = inlined_call_operand.vmem [shape: f32[32,1], index: 10, kind: input, shape index: {}]   ;;  %s2269_s11 = inlined_call_operand.hbm [shape: f32[2,32,256], index: 11, kind: output, shape index: {}]  }
   0x1   :  { %18 = vsyncpa [#allocation3 + $0x1], 0  ;;  %s1782_s17 = smov 0   ;;  %s1784_s18 = smov 0  }
   0x2   :  { %s1786_s19 = smov 0   ;;  %s1788_s20 = smov 0  }
   0x3 LB: > { %2271 = sst [smem:[#allocation5_spill]] %s1710_s19  ;;  %s1803_s21 = sadd.s32 4294967295, %s1714_s20   ;;  %s1714_s20 = sphi %s1788_s20, %s2279_s20   ;;  %s1710_s19 = sphi %s1786_s19, %s2276_s19   ;;  %s1706_s18 = sphi %s1784_s18, %s2278_s18   ;;  %s1702_s17 = sphi %s1782_s17, %s2277_s17  }
   0x4   : > { %s1390_s22 = sadd.s32 4294967294, %s1714_s20   ;;  %s1807_s23 = sadd.s32 1, %s1714_s20  }
   0x5   : > { %s267_s24 = sadd.s32 1, %s1710_s19  ;;  %s264_s25 = ssub.s32 %s1714_s20, %s1807_s23 }
   0x6   : > { %p277_p0 = scmp.ne.s32.totalorder %s1710_s19, %s1706_s18  ;;  %p265_p1 = scmp.eq.s32.totalorder %s264_s25, 0 }
   0x7   : > { %p278_p2 = scmp.eq.s32.totalorder %s1803_s21, 1  ;;  %p283_p3 = scmp.ne.s32.totalorder %s1706_s18, %s1702_s17 }
   0x8   : > { %p284_p4 = scmp.eq.s32.totalorder %s1390_s22, 1  ;;  %p1393_p7 = scmp.ge.s32.totalorder %s1714_s20, 1 }
   0x9   : > { %s1818_s26 = scalar_select %p265_p1, %s1710_s19, %s267_s24  }
   0xa   : > { %p1820_p5 = por %p278_p2, %p277_p0  ;;  %p1824_p6 = por %p284_p4, %p283_p3 }
   0xb   : > { %2272 = sst [smem:[#allocation6_spill]] %s1818_s26  ;;  %p340_p8 = scmp.lt.s32.totalorder %s1714_s20, 3 }
   0xd   : > { %p341_p9 = pnand %p1393_p7, %p340_p8 }
   0xe   : > { %p380_p10 = scmp.lt.s32.totalorder (!%p341_p9), %s1803_s21, 1  ;;  %s1429_s16 = sshll.u32 (!%p341_p9), %s1803_s21, 10 }
   0xf   : > { %344 = sbr.rel (%p341_p9) target bundleno = 925 (0x39d), region = 64  ;;  %s2210_s29 = scalar_lea.hbm (!%p341_p9), %s2269_s11, %s1429_s16 }
  0x10   : > { %s1719_s12 = smov (!%p341_p9), [#allocation2]  }
  0x14   : > { %v424_v0 = vld [vmem:[%s2259_s1 + $0xf8] sm:$0xff]  ;;  %v423_v4 = vld [vmem:[%s2259_s1 + $0xf0] sm:$0xff]  ;;  %v422_v8 = vld [vmem:[%s2259_s1 + $0xe8] sm:$0xff]  ;;  %s1966_s24 = scalar_select %p380_p10, %s1803_s21, 1  ;;  %vm1717_vm0 = vmmov 0   ;;  %vm634_vm1 = vcmask 261120  }
  0x15   : > { %v541_v1 = vld [vmem:[%s2260_s2 + $0xf8] sm:$0xff]  ;;  %1430 = vmatprep.subr.mxu0 %v424_v0  ;;  %v540_v5 = vld [vmem:[%s2260_s2 + $0xf0] sm:$0xff]  ;;  %v539_v9 = vld [vmem:[%s2260_s2 + $0xe8] sm:$0xff]  ;;  %vm808_vm2 = vcmask 64512   ;;  %vm1083_vm3 = vcmask 130048  }
  0x16   : > { %v408_v2 = vld [vmem:[%s2259_s1 + $0x78] sm:$0xff]  ;;  %1474 = vmatprep.subr.mxu1 %v541_v1  ;;  %v407_v6 = vld [vmem:[%s2259_s1 + $0x70] sm:$0xff]  ;;  %v406_v10 = vld [vmem:[%s2259_s1 + $0x68] sm:$0xff]  ;;  %s1428_s15 = sshll.u32 %s1966_s24, 6  ;;  %s377_s24 = sand.u32 1, %s1706_s18  }
  0x17   : > { %v525_v3 = vld [vmem:[%s2260_s2 + $0x78] sm:$0xff]  ;;  %1431 = vmatpush3.msra.mxu0 %v408_v2  ;;  %v524_v7 = vld [vmem:[%s2260_s2 + $0x70] sm:$0xff]  ;;  %v523_v11 = vld [vmem:[%s2260_s2 + $0x68] sm:$0xff]  ;;  %s2014_s19 = scalar_lea.vmem %s2258_s0, %s1428_s15  ;;  %s1394_s14 = sshll.u32 %s377_s24, 6 }
  0x18   : > { %1475 = vmatpush3.msra.mxu1 %v525_v3  ;;  %1432 = vmatprep.subr.mxu0 %v423_v4  ;;  %v421_v12 = vld [vmem:[%s2259_s1 + $0xe0] sm:$0xff]  ;;  %v420_v16 = vld [vmem:[%s2259_s1 + $0xd8] sm:$0xff]  ;;  %v419_v20 = vld [vmem:[%s2259_s1 + $0xd0] sm:$0xff]  ;;  %s2191_s15 = scalar_lea.vmem [#allocation2], %s1394_s14  ;;  %s2218_s21 = scalar_lea.sflag [#allocation3], %s377_s24 }
  0x19   : > { %1476 = vmatprep.subr.mxu1 %v540_v5  ;;  %1433 = vmatpush3.msra.mxu0 %v407_v6  ;;  %v538_v13 = vld [vmem:[%s2260_s2 + $0xe0] sm:$0xff]  ;;  %v537_v17 = vld [vmem:[%s2260_s2 + $0xd8] sm:$0xff]  ;;  %v536_v21 = vld [vmem:[%s2260_s2 + $0xd0] sm:$0xff]  ;;  %s1328_s26 = sshll.u32 %s2191_s15, 4  ;;  %s2212_s26 = int_to_ptr.vmem [resolvable:$true] %s1328_s26 }
  0x1a   : > { %1477 = vmatpush3.msra.mxu1 %v524_v7  ;;  %1434 = vmatprep.subr.mxu0 %v422_v8  ;;  %v405_v14 = vld [vmem:[%s2259_s1 + $0x60] sm:$0xff]  ;;  %v404_v18 = vld [vmem:[%s2259_s1 + $0x58] sm:$0xff]  ;;  %v403_v22 = vld [vmem:[%s2259_s1 + $0x50] sm:$0xff]  ;;  %v1716_v8 = vmov 0.0   ;;  %s1654_s30 = scalar_lea.vmem %s2212_s26, 1024 }
  0x1b   : > { %1478 = vmatprep.subr.mxu1 %v539_v9  ;;  %v522_v15 = vld [vmem:[%s2260_s2 + $0x60] sm:$0xff]  ;;  %1435 = vmatpush3.msra.mxu0 %v406_v10  ;;  %v521_v19 = vld [vmem:[%s2260_s2 + $0x58] sm:$0xff]  ;;  %v520_v23 = vld [vmem:[%s2260_s2 + $0x50] sm:$0xff]  ;;  %v1718_v10 = vmov 0   ;;  %p1655_p11 = scmp.ne.s32.totalorder %s2212_s26, %s1654_s30 }
  0x1c   : > { %1479 = vmatpush3.msra.mxu1 %v523_v11  ;;  %1436 = vmatprep.subr.mxu0 %v421_v12  ;;  %v418_v24 = vld [vmem:[%s2259_s1 + $0xc8] sm:$0xff]  ;;  %v417_v28 = vld [vmem:[%s2259_s1 + $0xc0] sm:$0xff]  ;;  %v416_v32 = vld [vmem:[%s2259_s1 + $0xb8] sm:$0xff] }
  0x1d   : > { %1480 = vmatprep.subr.mxu1 %v538_v13  ;;  %1437 = vmatpush3.msra.mxu0 %v405_v14  ;;  %v535_v25 = vld [vmem:[%s2260_s2 + $0xc8] sm:$0xff]  ;;  %v534_v29 = vld [vmem:[%s2260_s2 + $0xc0] sm:$0xff]  ;;  %v533_v33 = vld [vmem:[%s2260_s2 + $0xb8] sm:$0xff]  ;;  %p1656_p12 = pnand %p1655_p11, %p1820_p5 }
  0x1e   : > { %1481 = vmatpush3.msra.mxu1 %v522_v15  ;;  %1438 = vmatprep.subr.mxu0 %v420_v16  ;;  %v402_v26 = vld [vmem:[%s2259_s1 + $0x48] sm:$0xff]  ;;  %v401_v30 = vld [vmem:[%s2259_s1 + $0x40] sm:$0xff]  ;;  %v400_v34 = vld [vmem:[%s2259_s1 + $0x38] sm:$0xff] }
  0x1f   : > { %1482 = vmatprep.subr.mxu1 %v537_v17  ;;  %1439 = vmatpush3.msra.mxu0 %v404_v18  ;;  %v519_v27 = vld [vmem:[%s2260_s2 + $0x48] sm:$0xff]  ;;  %v518_v31 = vld [vmem:[%s2260_s2 + $0x40] sm:$0xff]  ;;  %v517_v35 = vld [vmem:[%s2260_s2 + $0x38] sm:$0xff]  ;;  %p1657_p13 = pneg %p1656_p12 }
  0x20   : > { %1483 = vmatpush3.msra.mxu1 %v521_v19  ;;  %1440 = vmatprep.subr.mxu0 %v419_v20  ;;  %v415_v36 = vld [vmem:[%s2259_s1 + $0xb0] sm:$0xff]  ;;  %v414_v40 = vld [vmem:[%s2259_s1 + $0xa8] sm:$0xff]  ;;  %v413_v44 = vld [vmem:[%s2259_s1 + $0xa0] sm:$0xff] }
  0x21   : > { %1484 = vmatprep.subr.mxu1 %v536_v21  ;;  %1441 = vmatpush3.msra.mxu0 %v403_v22  ;;  %v532_v37 = vld [vmem:[%s2260_s2 + $0xb0] sm:$0xff]  ;;  %v531_v41 = vld [vmem:[%s2260_s2 + $0xa8] sm:$0xff]  ;;  %v530_v45 = vld [vmem:[%s2260_s2 + $0xa0] sm:$0xff] }
  0x22   : > { %1485 = vmatpush3.msra.mxu1 %v520_v23  ;;  %1442 = vmatprep.subr.mxu0 %v418_v24  ;;  %v399_v38 = vld [vmem:[%s2259_s1 + $0x30] sm:$0xff]  ;;  %v398_v42 = vld [vmem:[%s2259_s1 + $0x28] sm:$0xff]  ;;  %v397_v46 = vld [vmem:[%s2259_s1 + $0x20] sm:$0xff] }
  0x23   : > { %1486 = vmatprep.subr.mxu1 %v535_v25  ;;  %1443 = vmatpush3.msra.mxu0 %v402_v26  ;;  %v516_v39 = vld [vmem:[%s2260_s2 + $0x30] sm:$0xff]  ;;  %v515_v43 = vld [vmem:[%s2260_s2 + $0x28] sm:$0xff]  ;;  %v514_v47 = vld [vmem:[%s2260_s2 + $0x20] sm:$0xff] }
  0x24   : > { %1487 = vmatpush3.msra.mxu1 %v519_v27  ;;  %1444 = vmatprep.subr.mxu0 %v417_v28  ;;  %v412_v48 = vld [vmem:[%s2259_s1 + $0x98] sm:$0xff]  ;;  %v411_v52 = vld [vmem:[%s2259_s1 + $0x90] sm:$0xff]  ;;  %v410_v56 = vld [vmem:[%s2259_s1 + $0x88] sm:$0xff] }
  0x25   : > { %1488 = vmatprep.subr.mxu1 %v534_v29  ;;  %1445 = vmatpush3.msra.mxu0 %v401_v30  ;;  %v529_v49 = vld [vmem:[%s2260_s2 + $0x98] sm:$0xff]  ;;  %v528_v53 = vld [vmem:[%s2260_s2 + $0x90] sm:$0xff]  ;;  %v527_v57 = vld [vmem:[%s2260_s2 + $0x88] sm:$0xff] }
  0x26   : > { %1489 = vmatpush3.msra.mxu1 %v518_v31  ;;  %1446 = vmatprep.subr.mxu0 %v416_v32  ;;  %v396_v50 = vld [vmem:[%s2259_s1 + $0x18] sm:$0xff]  ;;  %v395_v54 = vld [vmem:[%s2259_s1 + $0x10] sm:$0xff]  ;;  %v394_v58 = vld [vmem:[%s2259_s1 + $0x8] sm:$0xff] }
  0x27   : > { %1490 = vmatprep.subr.mxu1 %v533_v33  ;;  %1447 = vmatpush3.msra.mxu0 %v400_v34  ;;  %v513_v51 = vld [vmem:[%s2260_s2 + $0x18] sm:$0xff]  ;;  %v512_v55 = vld [vmem:[%s2260_s2 + $0x10] sm:$0xff]  ;;  %v511_v59 = vld [vmem:[%s2260_s2 + $0x8] sm:$0xff] }
  0x28   : > { %1491 = vmatpush3.msra.mxu1 %v517_v35  ;;  %1448 = vmatprep.subr.mxu0 %v415_v36  ;;  %v409_v60 = vld [vmem:[%s2259_s1 + $0x80] sm:$0xff]  ;;  %v2032_v63 = vld [vmem:[%s2014_s19 + $0x8] sm:$0xff]  ;;  %v2042_v2 = vld [vmem:[%s2014_s19 + $0x18] sm:$0xff] }
  0x29   : > { %1492 = vmatprep.subr.mxu1 %v532_v37  ;;  %1449 = vmatpush3.msra.mxu0 %v399_v38  ;;  %v526_v61 = vld [vmem:[%s2260_s2 + $0x80] sm:$0xff]  ;;  %v2050_v3 = vld [vmem:[%s2014_s19 + $0x10] sm:$0xff]  ;;  %v2053_v4 = vld [vmem:[%s2014_s19 + $0x28] sm:$0xff] }
  0x2a   : > { %1493 = vmatpush3.msra.mxu1 %v516_v39  ;;  %1450 = vmatprep.subr.mxu0 %v414_v40  ;;  %v393_v62 = vld [vmem:[%s2259_s1] sm:$0xff]  ;;  %v2063_v6 = vld [vmem:[%s2014_s19 + $0x38] sm:$0xff]  ;;  %v2070_v7 = vld [vmem:[%s2014_s19 + $0x30] sm:$0xff] }
  0x2b   : > { %1494 = vmatprep.subr.mxu1 %v531_v41  ;;  %1451 = vmatpush3.msra.mxu0 %v398_v42  ;;  %v510_v0 = vld [vmem:[%s2260_s2] sm:$0xff]  ;;  %v935_v12 = vld [vmem:[%s2268_s10 + $0x8] sm:$0xff]  ;;  %v936_v13 = vld [vmem:[%s2268_s10 + $0x10] sm:$0xff] }
  0x2c   : > { %1495 = vmatpush3.msra.mxu1 %v515_v43  ;;  %1452 = vmatprep.subr.mxu0 %v413_v44  ;;  %v2038_v1 = vld [vmem:[%s2014_s19] sm:$0xff]  ;;  %v937_v14 = vld [vmem:[%s2268_s10 + $0x18] sm:$0xff]  ;;  %v785_v43 = vld [vmem:[%s2266_s8 + $0x8] sm:$0xff] }
  0x2d   : > { %1496 = vmatprep.subr.mxu1 %v530_v45  ;;  %1453 = vmatpush3.msra.mxu0 %v397_v46  ;;  %v2060_v5 = vld [vmem:[%s2014_s19 + $0x20] sm:$0xff]  ;;  %v786_v44 = vld [vmem:[%s2266_s8 + $0x10] sm:$0xff]  ;;  %v787_v45 = vld [vmem:[%s2266_s8 + $0x18] sm:$0xff]  ;;  %s1658_s19 = sshll.u32 %s1719_s12, 4  ;;  %s1659_s19 = int_to_ptr.vmem [resolvable:$false] %s1658_s19 }
  0x2e   : > { %1497 = vmatpush3.msra.mxu1 %v514_v47  ;;  %1454 = vmatprep.subr.mxu0 %v412_v48  ;;  %v628_v9 = vld [vmem:[%s2264_s6] sm:$0xff]  ;;  %s1660_s13 = scalar_lea.vmem %s1659_s19, 2048  ;;  %p1661_p0 = scmp.lt.s32.totalorder %s2212_s26, %s1659_s19 }
  0x2f   : > { %1498 = vmatprep.subr.mxu1 %v529_v49  ;;  %1455 = vmatpush3.msra.mxu0 %v396_v50  ;;  %v784_v11 = vld [vmem:[%s2266_s8] sm:$0xff]  ;;  %p1662_p1 = scmp.lt.s32.totalorder %s1660_s13, %s1654_s30 }
  0x30   : > { %1499 = vmatpush3.msra.mxu1 %v513_v51  ;;  %1456 = vmatprep.subr.mxu0 %v411_v52  ;;  %v627_v39 = vld [vmem:[%s2263_s5] sm:$0xff] }
  0x31   : > { %1500 = vmatprep.subr.mxu1 %v528_v53  ;;  %1457 = vmatpush3.msra.mxu0 %v395_v54  ;;  %v780_v40 = vld [vmem:[%s2265_s7] sm:$0xff]  ;;  %p1663_p2 = por %p1662_p1, %p1661_p0 }
  0x32   : > { %1501 = vmatpush3.msra.mxu1 %v512_v55  ;;  %1458 = vmatprep.subr.mxu0 %v410_v56  ;;  %v930_v41 = vld [vmem:[%s2267_s9] sm:$0xff]  ;;  %v781_v55 = vld [vmem:[%s2265_s7 + $0x8] sm:$0xff] }
  0x33   : > { %1502 = vmatprep.subr.mxu1 %v527_v57  ;;  %1459 = vmatpush3.msra.mxu0 %v394_v58  ;;  %v934_v42 = vld [vmem:[%s2268_s10] sm:$0xff]  ;;  %v931_v56 = vld [vmem:[%s2267_s9 + $0x8] sm:$0xff]  ;;  %v932_v57 = vld [vmem:[%s2267_s9 + $0x10] sm:$0xff]  ;;  %p1664_p3 = pnand %p1663_p2, %p1657_p13 }
  0x34   : > { %1503 = vmatpush3.msra.mxu1 %v511_v59  ;;  %1460 = vmatprep.subr.mxu0 %v409_v60  ;;  %v782_v58 = vld [vmem:[%s2265_s7 + $0x10] sm:$0xff]  ;;  %v933_v59 = vld [vmem:[%s2267_s9 + $0x18] sm:$0xff] }
  0x35   : > { %1504 = vmatprep.subr.mxu1 %v526_v61  ;;  %1461 = vmatpush3.msra.mxu0 %v393_v62  ;;  %v783_v60 = vld [vmem:[%s2265_s7 + $0x18] sm:$0xff] }
  0x36   : > { %489 = vmatprep.mubr.f32.mxu0 %v2032_v63  ;;  %1505 = vmatpush3.msra.mxu1 %v510_v0  ;;  %v1082_v61 = vld [vmem:[%s2261_s3 + $0x18] sm:$0xff]  ;;  %v1081_v0 = vld [vmem:[%s2261_s3 + $0x10] sm:$0xff] }
  0x37   : > { %606 = vmatprep.mubr.f32.mxu1 %v2032_v63  ;;  %490 = vmatmul.mubr.f32.vlgmr.msra.gmra.mxu0 %v2038_v1  ;;  %v1188_v62 = vld [vmem:[%s2262_s4 + $0x18] sm:$0xff] }
  0x38   : > { %607 = vmatmul.mubr.f32.vlgmr.msra.gmra.mxu1 %v2038_v1  ;;  %494 = vmatprep.mubr.f32.mxu0 %v2042_v2 }
  0x39   : > { %611 = vmatprep.mubr.f32.mxu1 %v2042_v2  ;;  %1538 = vmatprep.subr.mxu0 %v1716_v8 }
  0x3a   : > { %1549 = vmatprep.subr.mxu1 %v1716_v8  ;;  %1620 = vset.pattern.permute.xlu0 %v1718_v10 }
  0x3b   : > { %495 = vmatmul.mubr.f32.gmra.mxu0 %v2050_v3  ;;  %1621 = vset.pattern.permute.xlu1 %v1718_v10  ;;  %v1080_v10 = vld [vmem:[%s2261_s3 + $0x8] sm:$0xff] }
  0x3c   : > { %612 = vmatmul.mubr.f32.gmra.mxu1 %v2050_v3  ;;  %499 = vmatprep.mubr.f32.mxu0 %v2053_v4 }
  0x3d   : > { %616 = vmatprep.mubr.f32.mxu1 %v2053_v4  ;;  %631 = vperm.xlu0 %1620, %v628_v9   ;;  %v1187_v9 = vld [vmem:[%s2262_s4 + $0x10] sm:$0xff] }
  0x3e   : > { %940 = vperm.xlu1 %1621, %v934_v42  }
  0x3f   : > { %500 = vmatmul.mubr.f32.gmra.mxu0 %v2060_v5 }
  0x40   : > { %617 = vmatmul.mubr.f32.gmra.mxu1 %v2060_v5  ;;  %504 = vmatprep.mubr.f32.mxu0 %v2063_v6 }
  0x41   : > { %621 = vmatprep.mubr.f32.mxu1 %v2063_v6  ;;  %790 = vperm.xlu0 %1620, %v784_v11   ;;  %v1186_v11 = vld [vmem:[%s2262_s4 + $0x8] sm:$0xff] }
  0x42   : > { %795 = vperm.xlu1 %1621, %v785_v43  }
  0x43   : > { %505 = vmatmul.mubr.f32.gmra.mxu0 %v2070_v7 }
  0x44   : > { %622 = vmatmul.mubr.f32.gmra.mxu1 %v2070_v7  ;;  %1546 = vmatprep.mubr.msk.f32.mxu0 %vm1717_vm0, %v1716_v8 }
  0x45   : > { %1557 = vmatprep.mubr.msk.f32.mxu1 %vm1717_vm0, %v1716_v8  ;;  %945 = vperm.xlu0 %1620, %v935_v12   ;;  %v1079_v12 = vld [vmem:[%s2261_s3] sm:$0xff] }
  0x46   : > { %800 = vperm.xlu1 %1621, %v786_v44  }
  0x49   : > { %950 = vperm.xlu0 %1620, %v936_v13   ;;  %v1185_v13 = vld [vmem:[%s2262_s4] sm:$0xff] }
  0x4a   : > { %805 = vperm.xlu1 %1621, %v787_v45  }
  0x4d   : > { %955 = vperm.xlu0 %1620, %v937_v14  }
  0xb8   : > { %v632_v46 = vpop.permute.xlu0 %631 }
  0xb9   : > { %v941_v14 = vpop.permute.xlu1 %940 }
  0xf7   : > { %v1462_v15 = vpop.f32.mrf.mxu0 }
  0xf8   : > { %v1506_v16 = vpop.f32.mrf.mxu1 }
  0xf9   : > { %v1463_v17 = vpop.f32.mrf.mxu0 }
  0xfa   : > { %v1507_v18 = vpop.f32.mrf.mxu1  ;;  %v1464_v37 = vadd.f32 %v1463_v17, %v1462_v15  ;;  %v791_v15 = vpop.permute.xlu0 %790 }
  0xfb   : > { %v1465_v19 = vpop.f32.mrf.mxu0  ;;  %v1508_v38 = vadd.f32 %v1507_v18, %v1506_v16  ;;  %v796_v16 = vpop.permute.xlu1 %795 }
  0xfc   : > { %v1509_v20 = vpop.f32.mrf.mxu1 }
  0xfd   : > { %v1466_v21 = vpop.f32.mrf.mxu0 }
  0xfe   : > { %v1510_v22 = vpop.f32.mrf.mxu1  ;;  %v1467_v35 = vadd.f32 %v1466_v21, %v1465_v19  ;;  %v946_v17 = vpop.permute.xlu0 %945 }
  0xff   : > { %v1468_v23 = vpop.f32.mrf.mxu0  ;;  %v1511_v36 = vadd.f32 %v1510_v22, %v1509_v20  ;;  %v801_v18 = vpop.permute.xlu1 %800 }
 0x100   : > { %v1512_v24 = vpop.f32.mrf.mxu1 }
 0x101   : > { %v1469_v25 = vpop.f32.mrf.mxu0 }
 0x102   : > { %v1513_v26 = vpop.f32.mrf.mxu1  ;;  %v1470_v33 = vadd.f32 %v1469_v25, %v1468_v23  ;;  %v951_v21 = vpop.permute.xlu0 %950 }
 0x103   : > { %v1471_v27 = vpop.f32.mrf.mxu0  ;;  %v1514_v34 = vadd.f32 %v1513_v26, %v1512_v24 }
 0x104   : > { %v1515_v28 = vpop.f32.mrf.mxu1 }
 0x105   : > { %v1472_v29 = vpop.f32.mrf.mxu0 }
 0x106   : > { %v1516_v30 = vpop.f32.mrf.mxu1  ;;  %v1473_v31 = vadd.f32 %v1472_v29, %v1471_v27 }
 0x107   : > { %v1517_v32 = vadd.f32 %v1516_v30, %v1515_v28 }
 0x108   : > { %1539 = vmatpush3.msra.mxu0 %v1473_v31 }
 0x109   : > { %1550 = vmatpush3.msra.mxu1 %v1517_v32  ;;  %1540 = vmatprep.subr.mxu0 %v1716_v8 }
 0x10a   : > { %1551 = vmatprep.subr.mxu1 %v1716_v8  ;;  %1541 = vmatpush3.msra.mxu0 %v1470_v33 }
 0x10b   : > { %1552 = vmatpush3.msra.mxu1 %v1514_v34  ;;  %1542 = vmatprep.subr.mxu0 %v1716_v8  ;;  %v806_v34 = vpop.permute.xlu1 %805 }
 0x10c   : > { %1553 = vmatprep.subr.mxu1 %v1716_v8  ;;  %1543 = vmatpush3.msra.mxu0 %v1467_v35 }
 0x10d   : > { %1554 = vmatpush3.msra.mxu1 %v1511_v36  ;;  %1544 = vmatprep.subr.mxu0 %v1716_v8 }
 0x10e   : > { %1555 = vmatprep.subr.mxu1 %v1716_v8  ;;  %1545 = vmatpush3.msra.mxu0 %v1464_v37  ;;  %v956_v37 = vpop.permute.xlu0 %955 }
 0x10f   : > { %1556 = vmatpush3.msra.mxu1 %v1508_v38  ;;  %1547 = vmatmul.mubr.msk.f32.vlgmr.msra.gmra.mxu0 %vm634_vm1, %v627_v39 }
 0x110   : > { %1558 = vmatmul.mubr.msk.f32.vlgmr.msra.gmra.mxu1 %vm634_vm1, %v627_v39  ;;  %1562 = vmatprep.mubr.msk.f32.mxu0 %vm808_vm2, %v780_v40 }
 0x111   : > { %1570 = vmatprep.mubr.msk.f32.mxu1 %vm808_vm2, %v930_v41 }
 0x1cf   : > { %v704_v47 = vpop.f32.mrf.mxu0 }
 0x1d0   : > { %v775_v48 = vpop.f32.mrf.mxu1  ;;  %v705_v49 = vadd.f32 %v704_v47, %v632_v46 }
 0x1d1   : > { %v776_v50 = vadd.f32 %v775_v48, %v632_v46  ;;  %v1548_v51 = vpop.f32.mrf.mxu0 }
 0x1d2   : > { %v1559_v52 = vpop.f32.mrf.mxu1  ;;  %v708_v53 = vmax.f32 %v705_v49, 0.0 }
 0x1d3   : > { %v779_v54 = vmax.f32 %v776_v50, 0.0 }
 0x1d4   : > { %1560 = vmatprep.subr.mxu0 %v708_v53 }
 0x1d5   : > { %1568 = vmatprep.subr.mxu1 %v779_v54  ;;  %1561 = vmatpush3.msra.mxu0 %v708_v53 }
 0x1d6   : > { %1569 = vmatpush3.msra.mxu1 %v779_v54  ;;  %1563 = vmatmul.mubr.msk.f32.vlgmr.msra.gmra.mxu0 %vm808_vm2, %v781_v55 }
 0x1d7   : > { %1571 = vmatmul.mubr.msk.f32.vlgmr.msra.gmra.mxu1 %vm808_vm2, %v931_v56  ;;  %1565 = vmatprep.mubr.msk.f32.mxu0 %vm808_vm2, %v782_v58 }
 0x1d8   : > { %1573 = vmatprep.mubr.msk.f32.mxu1 %vm808_vm2, %v932_v57  ;;  %1124 = vmatprep.subr.mxu0 %v1082_v61 }
 0x1d9   : > { %1229 = vmatprep.subr.mxu1 %v1188_v62  ;;  %1125 = vmatpush1.msra.mxu0 %v1081_v0 }
 0x1da   : > { %1566 = vmatmul.mubr.msk.f32.gmra.mxu0 %vm808_vm2, %v783_v60  ;;  %1230 = vmatpush1.msra.mxu1 %v1187_v9 }
 0x1db   : > { %1574 = vmatmul.mubr.msk.f32.gmra.mxu1 %vm808_vm2, %v933_v59  ;;  %1160 = vmatprep.mubr.f32.mxu0 %v1716_v8 }
 0x1dc   : > { %1265 = vmatprep.mubr.f32.mxu1 %v1716_v8  ;;  %1126 = vmatprep.subr.mxu0 %v1080_v10 }
 0x1dd   : > { %1231 = vmatprep.subr.mxu1 %v1186_v11  ;;  %1127 = vmatpush1.msra.mxu0 %v1079_v12 }
 0x1de   : > { %1232 = vmatpush1.msra.mxu1 %v1185_v13 }
 0x296   : > { %v1564_v19 = vpop.f32.mrf.mxu0 }
 0x297   : > { %v1572_v20 = vpop.f32.mrf.mxu1  ;;  %v893_v23 = vadd.f32 %v1564_v19, %v796_v16 }
 0x298   : > { %v1042_v22 = vadd.f32 %v1572_v20, %v946_v17  ;;  %v887_v24 = vpop.f32.mrf.mxu0 }
 0x299   : > { %v1036_v25 = vpop.f32.mrf.mxu1  ;;  %v888_v27 = vadd.f32 %v887_v24, %v791_v15  ;;  %v1404_v29 = vmul.f32 -1.442695, %v893_v23 }
 0x29a   : > { %v1412_v26 = vmul.f32 -1.442695, %v1042_v22  ;;  %v1037_v28 = vadd.f32 %v1036_v25, %v941_v14  ;;  %v1567_v31 = vpop.f32.mrf.mxu0 }
 0x29b   : > { %v1575_v30 = vpop.f32.mrf.mxu1  ;;  %v1403_v32 = vmul.f32 -1.442695, %v888_v27  ;;  %v903_v40 = vadd.f32 %v1567_v31, %v806_v34 }
 0x29c   : > { %1622 = vpow2.f32 %v1412_v26  ;;  %v1411_v33 = vmul.f32 -1.442695, %v1037_v28  ;;  %v897_v36 = vpop.f32.mrf.mxu0  ;;  %v1052_v41 = vadd.f32 %v1575_v30, %v956_v37 }
 0x29d   : > { %1624 = vpow2.f32 %v1404_v29  ;;  %v1046_v35 = vpop.f32.mrf.mxu1  ;;  %v898_v39 = vadd.f32 %v897_v36, %v801_v18  ;;  %v1406_v44 = vmul.f32 -1.442695, %v903_v40 }
 0x29e   : > { %1626 = vpow2.f32 %v1403_v32  ;;  %v1047_v38 = vadd.f32 %v1046_v35, %v951_v21  ;;  %v1414_v45 = vmul.f32 -1.442695, %v1052_v41 }
 0x29f   : > { %1628 = vpow2.f32 %v1411_v33  ;;  %v1405_v43 = vmul.f32 -1.442695, %v898_v39 }
 0x2a0   : > { %v1413_v42 = vmul.f32 -1.442695, %v1047_v38 }
 0x2a2   : > { %1630 = vpow2.f32 %v1413_v42 }
 0x2a3   : > { %1632 = vpow2.f32 %v1405_v43 }
 0x2a4   : > { %1634 = vpow2.f32 %v1406_v44 }
 0x2a5   : > { %1636 = vpow2.f32 %v1414_v45 }
 0x2a9   : > { %v1623_v46 = vpop.eup %1622 }
 0x2aa   : > { %v1625_v47 = vpop.eup %1624  ;;  %v1068_v54 = vadd.f32 1.0, %v1623_v46 }
 0x2ab   : > { %v1627_v48 = vpop.eup %1626  ;;  %v919_v52 = vadd.f32 1.0, %v1625_v47 }
 0x2ac   : > { %v1629_v49 = vpop.eup %1628  ;;  %v918_v50 = vadd.f32 1.0, %v1627_v48 }
 0x2ad   : > { %v1067_v51 = vadd.f32 1.0, %v1629_v49 }
 0x2ae   : > { %1638 = vrcp.f32 %v918_v50 }
 0x2af   : > { %v1631_v53 = vpop.eup %1630  ;;  %1640 = vrcp.f32 %v1067_v51 }
 0x2b0   : > { %v1633_v55 = vpop.eup %1632  ;;  %1642 = vrcp.f32 %v919_v52  ;;  %v1069_v58 = vadd.f32 1.0, %v1631_v53 }
 0x2b1   : > { %v920_v56 = vadd.f32 1.0, %v1633_v55  ;;  %v1635_v57 = vpop.eup %1634  ;;  %1644 = vrcp.f32 %v1068_v54 }
 0x2b2   : > { %v1637_v59 = vpop.eup %1636  ;;  %v921_v60 = vadd.f32 1.0, %v1635_v57 }
 0x2b3   : > { %1646 = vrcp.f32 %v920_v56  ;;  %v1070_v61 = vadd.f32 1.0, %v1637_v59 }
 0x2b4   : > { %1648 = vrcp.f32 %v1069_v58 }
 0x2b5   : > { %1650 = vrcp.f32 %v921_v60 }
 0x2b6   : > { %1652 = vrcp.f32 %v1070_v61 }
 0x2bb   : > { %v1639_v62 = vpop.eup %1638 }
 0x2bc   : > { %v1641_v0 = vpop.eup %1640  ;;  %1415 = vmatmul.mubr.msk.f32.vlgmr.msra.gmra.mxu0 %vm1083_vm3, %v1639_v62 }
 0x2bd   : > { %1419 = vmatmul.mubr.msk.f32.vlgmr.msra.gmra.mxu1 %vm1083_vm3, %v1641_v0  ;;  %1166 = vmatprep.mubr.f32.mxu0 %v1716_v8  ;;  %v1643_v9 = vpop.eup %1642 }
 0x2be   : > { %1271 = vmatprep.mubr.f32.mxu1 %v1716_v8  ;;  %v1645_v10 = vpop.eup %1644 }
 0x2c0   : > { %1416 = vmatmul.mubr.msk.f32.gmra.mxu0 %vm1083_vm3, %v1643_v9  ;;  %v1647_v11 = vpop.eup %1646 }
 0x2c1   : > { %1420 = vmatmul.mubr.msk.f32.gmra.mxu1 %vm1083_vm3, %v1645_v10  ;;  %1172 = vmatprep.mubr.f32.mxu0 %v1716_v8  ;;  %v1649_v12 = vpop.eup %1648 }
 0x2c2   : > { %1277 = vmatprep.mubr.f32.mxu1 %v1716_v8  ;;  %v1651_v13 = vpop.eup %1650 }
 0x2c3   : > { %v1653_v14 = vpop.eup %1652 }
 0x2c4   : > { %1417 = vmatmul.mubr.msk.f32.gmra.mxu0 %vm1083_vm3, %v1647_v11 }
 0x2c5   : > { %1421 = vmatmul.mubr.msk.f32.gmra.mxu1 %vm1083_vm3, %v1649_v12  ;;  %1178 = vmatprep.mubr.f32.mxu0 %v1716_v8 }
 0x2c6   : > { %1283 = vmatprep.mubr.f32.mxu1 %v1716_v8 }
 0x2c8   : > { %1418 = vmatmul.mubr.msk.f32.gmra.mxu0 %vm1083_vm3, %v1651_v13 }
 0x2c9   : > { %1422 = vmatmul.mubr.msk.f32.gmra.mxu1 %vm1083_vm3, %v1653_v14 }
 0x37c   : > { %v1162_v15 = vpop.f32.mrf.mxu0 }
 0x37d   : > { %v1290_v16 = vmul.f32 %v1162_v15, %v2038_v1  ;;  %v1267_v17 = vpop.f32.mrf.mxu1 }
 0x37e   : > { %v1164_v18 = vpop.f32.mrf.mxu0 }
 0x37f   : > { %v1298_v19 = vmul.f32 %v1290_v16, %v1267_v17  ;;  %v1291_v20 = vmul.f32 %v1164_v18, %v2032_v63  ;;  %v1269_v21 = vpop.f32.mrf.mxu1 }
 0x380   : > { %v1168_v22 = vpop.f32.mrf.mxu0 }
 0x381   : > { %1306 = vst [vmem:[%s2191_s15] sm:$0xff] %v1298_v19  ;;  %v1299_v8 = vmul.f32 %v1291_v20, %v1269_v21  ;;  %v1292_v23 = vmul.f32 %v1168_v22, %v2050_v3  ;;  %v1273_v24 = vpop.f32.mrf.mxu1 }
 0x382   : > { %v1170_v25 = vpop.f32.mrf.mxu0 }
 0x383   : > { %1307 = vst [vmem:[%s2191_s15 + $0x8] sm:$0xff] %v1299_v8  ;;  %v1300_v1 = vmul.f32 %v1292_v23, %v1273_v24  ;;  %v1293_v26 = vmul.f32 %v1170_v25, %v2042_v2  ;;  %v1275_v63 = vpop.f32.mrf.mxu1 }
 0x384   : > { %v1174_v27 = vpop.f32.mrf.mxu0 }
 0x385   : > { %1308 = vst [vmem:[%s2191_s15 + $0x10] sm:$0xff] %v1300_v1  ;;  %v1301_v28 = vmul.f32 %v1293_v26, %v1275_v63  ;;  %v1294_v29 = vmul.f32 %v1174_v27, %v2060_v5  ;;  %v1279_v30 = vpop.f32.mrf.mxu1 }
 0x386   : > { %v1176_v31 = vpop.f32.mrf.mxu0 }
 0x387   : > { %1309 = vst [vmem:[%s2191_s15 + $0x18] sm:$0xff] %v1301_v28  ;;  %v1302_v3 = vmul.f32 %v1294_v29, %v1279_v30  ;;  %v1295_v32 = vmul.f32 %v1176_v31, %v2053_v4  ;;  %v1281_v33 = vpop.f32.mrf.mxu1 }
 0x388   : > { %v1180_v34 = vpop.f32.mrf.mxu0 }
 0x389   : > { %1310 = vst [vmem:[%s2191_s15 + $0x20] sm:$0xff] %v1302_v3  ;;  %v1303_v2 = vmul.f32 %v1295_v32, %v1281_v33  ;;  %v1296_v35 = vmul.f32 %v1180_v34, %v2070_v7  ;;  %v1285_v36 = vpop.f32.mrf.mxu1 }
 0x38a   : > { %v1182_v5 = vpop.f32.mrf.mxu0 }
 0x38b   : > { %1311 = vst [vmem:[%s2191_s15 + $0x28] sm:$0xff] %v1303_v2  ;;  %v1304_v37 = vmul.f32 %v1296_v35, %v1285_v36  ;;  %v1297_v38 = vmul.f32 %v1182_v5, %v2063_v6  ;;  %v1287_v39 = vpop.f32.mrf.mxu1 }
 0x38d   : > { %1312 = vst [vmem:[%s2191_s15 + $0x30] sm:$0xff] %v1304_v37  ;;  %v1305_v4 = vmul.f32 %v1297_v38, %v1287_v39 }
 0x38f   : > { %1313 = vst [vmem:[%s2191_s15 + $0x38] sm:$0xff] %v1305_v4 }
 0x390   : > { %1667 = shalt.err (!%p1664_p3)
}
 0x391   : > { %s1668_s24 = scalar_lea.hbm %s2210_s29, 1024  ;;  %s1672_s16 = scalar_lea.hbm %s2269_s11, 2048 }
 0x392   : > { %p1669_p4 = scmp.ne.s32.totalorder %s2210_s29, %s1668_s24  ;;  %p1673_p9 = scmp.lt.s32.totalorder %s2210_s29, %s2269_s11 }
 0x393   : > { %p1674_p10 = scmp.lt.s32.totalorder %s1672_s16, %s1668_s24 }
 0x394   : > { %p1670_p7 = pnand %p1669_p4, %p1820_p5 }
 0x395   : > { %p1675_p11 = por %p1674_p10, %p1673_p9 }
 0x396   : > { %p1671_p8 = pneg %p1670_p7 }
 0x398   : > { %p1676_p12 = pnand %p1675_p11, %p1671_p8 }
 0x39a   : > { %1679 = shalt.err (!%p1676_p12)
}
 0x39b   : > { %s1720_s30 = smov 256   ;;  %s1721_s12 = smov 16  }
 0x39c   : > { %1576 = dma.vmem_to_hbm [thread:$0]  (%p1820_p5), %s2212_s26, 1024, %s2210_s29, %s2218_s21, %s1720_s30, %s1720_s30, %s1721_s12  }
 0x39d PF: > { %p1582_p13 = scmp.ge.s32.totalorder %s1714_s20, 2  ;;  %s1343_s19 = sand.u32 1, %s1702_s17  }
 0x39e   : > { %s1344_s13 = scalar_lea.sflag [#allocation3], %s1343_s19 }
 0x39f   : > { %p1579_p0 = pnand %p1582_p13, %p1824_p6 }
 0x3a1   : > { %p1580_p1 = pneg %p1579_p0 }
 0x3a3   : > { %1697 = dma.done.wait (%p1580_p1), %s1344_s13, 1024  }
 0x3a4   : > { %1699 = vsyncadd (%p1580_p1), %s1344_s13, 4294966272  ;;  %s2275_s24 = sld [smem:[#allocation5_spill]]  ;;  %p21_p2 = scmp.ge.s32.totalorder %s1807_s23, 4  }
 0x3a5   : > { %s2276_s19 = sld [smem:[#allocation6_spill]]  ;;  %s2277_s17 = smov %s1706_s18 }
 0x3a6   : > { %s2279_s20 = smov %s1807_s23  ;;  %23 = sbr.rel (!%p21_p2) target bundleno = 3 (0x3), region = 99 }
 0x3aa   : > { %s2278_s18 = smov %s2275_s24 }
 0x3ab   :  { %1349 = vsyncpa [#allocation3], 1 }
 0x3ac   :  { %1351 = vsyncpa [#allocation3 + $0x1], 1 }

</bundles_post_ra>
